<compile_context>
chip_gen: v6e
topology: v6e:2x2x1
jax: 0.10.0
libtpu: 0.0.40
codegen_flags: <defaults>
</compile_context>

<pallas_src>
import jax
import jax.numpy as jnp
from jax.experimental import pallas as pl
from jax.experimental.pallas import tpu as pltpu


def _round_up(n, m):
    return ((n + m - 1) // m) * m


def _state_constraint_kernel(x_ref, w1_ref, b1_ref, w2_ref, b2_ref, o_ref):
    # x_ref: (TB, P*D) -- P batch rows packed per 128-lane row.
    x = x_ref[...]
    h = jnp.tanh(
        jnp.dot(x, w1_ref[...], preferred_element_type=jnp.float32) + b1_ref[...]
    )  # (TB, P*16)
    y = jnp.tanh(
        jnp.dot(h, w2_ref[...], preferred_element_type=jnp.float32) + b2_ref[...]
    )  # (TB, P)
    # Lane-dense store: batch on the lane axis -> unmasked vst + contiguous
    # writeback DMA.  (XLU transpose; free slot in this memory-bound regime.)
    o_ref[...] = jnp.transpose(y)[None, :, :].astype(o_ref.dtype)  # (1, P, TB)


def state_constraint_forward(x, w1, b1, w2, b2, *, tb_max=8192):
    """x: (B, D) f32; w1: (D, 16); b1: (1, 16) or (16,); w2: (16, 1); b2: (1,1) or (1,)."""
    x = jnp.asarray(x, jnp.float32)
    B, D = x.shape
    H = w1.shape[1]
    b1 = jnp.reshape(b1, (1, H)).astype(jnp.float32)
    b2 = jnp.reshape(b2, (1, 1)).astype(jnp.float32)
    w1 = jnp.asarray(w1, jnp.float32)
    w2 = jnp.asarray(w2, jnp.float32)

    # Pack P batch rows per 128-lane vreg row when D divides 128.
    P = (128 // D) if (D <= 128 and 128 % D == 0) else 1
    PD, PH = P * D, P * H

    if P > 1:
        # Block-diagonal weights keep the P packed rows independent.
        w1p = jnp.kron(jnp.eye(P, dtype=jnp.float32), w1)  # (P*D, P*H)
        w2p = jnp.kron(jnp.eye(P, dtype=jnp.float32), w2)  # (P*H, P)
        b1p = jnp.tile(b1, (1, P))                          # (1, P*H)
        b2p = jnp.tile(b2, (1, P))                          # (1, P)
    else:
        w1p, w2p, b1p, b2p = w1, w2, b1, b2

    # Packed-row count, padded so the grid tiles evenly (sublane multiple of 8).
    r_raw = -(-B // P)
    tb = min(int(tb_max), _round_up(r_raw, 8))
    R = _round_up(r_raw, tb)
    G = R // tb
    Bp = R * P

    x_pad = jnp.pad(x, ((0, Bp - B), (0, 0)))
    x_packed = x_pad.reshape(R, PD)

    out = pl.pallas_call(
        _state_constraint_kernel,
        out_shape=jax.ShapeDtypeStruct((G, P, tb), jnp.float32),
        grid=(G,),
        in_specs=[
            pl.BlockSpec((tb, PD), lambda i: (i, 0)),   # streamed batch tiles
            pl.BlockSpec((PD, PH), lambda i: (0, 0)),   # weights: resident
            pl.BlockSpec((1, PH), lambda i: (0, 0)),
            pl.BlockSpec((PH, P), lambda i: (0, 0)),
            pl.BlockSpec((1, P), lambda i: (0, 0)),
        ],
        out_specs=pl.BlockSpec((1, P, tb), lambda i: (i, 0, 0)),
        compiler_params=pltpu.CompilerParams(
            dimension_semantics=("parallel",),
        ),
    )(x_packed, w1p, b1p, w2p, b2p)

    # out[g, j, t] holds batch row (g*tb + t)*P + j -> restore batch order.
    y = jnp.transpose(out, (0, 2, 1)).reshape(Bp, 1)
    return y[:B]


def init_params(key, input_size):
    """Deterministic init mimicking nn.Linear's U(-1/sqrt(fan_in), 1/sqrt(fan_in))."""
    k1, k2, k3, k4 = jax.random.split(key, 4)
    bound1 = 1.0 / jnp.sqrt(jnp.float32(input_size))
    bound2 = 1.0 / jnp.sqrt(jnp.float32(16))
    w1 = jax.random.uniform(k1, (input_size, 16), jnp.float32, -bound1, bound1)
    b1 = jax.random.uniform(k2, (1, 16), jnp.float32, -bound1, bound1)
    w2 = jax.random.uniform(k3, (16, 1), jnp.float32, -bound2, bound2)
    b2 = jax.random.uniform(k4, (1, 1), jnp.float32, -bound2, bound2)
    return w1, b1, w2, b2


def reference_forward(x, w1, b1, w2, b2):
    h = jnp.tanh(x @ w1 + jnp.reshape(b1, (1, -1)))
    return jnp.tanh(h @ w2 + jnp.reshape(b2, (1, -1)))


if __name__ == "__main__":
    key = jax.random.PRNGKey(0)
    kx, kp, kx2 = jax.random.split(key, 3)

    batch, input_size = 8, 32
    x = jax.random.normal(kx, (batch, input_size), jnp.float32)
    w1, b1, w2, b2 = init_params(kp, input_size)

    out = state_constraint_forward(x, w1, b1, w2, b2)
    out = jax.block_until_ready(out)
    ref = reference_forward(x, w1, b1, w2, b2)
    assert out.shape == (batch, 1)
    assert jnp.allclose(out, ref, atol=1e-5, rtol=1e-5)

    # Exercise the multi-tile grid path (padding + >1 grid step) at small cost.
    batch2 = 100
    x2 = jax.random.normal(kx2, (batch2, input_size), jnp.float32)
    out2 = jax.block_until_ready(
        state_constraint_forward(x2, w1, b1, w2, b2, tb_max=8)
    )
    ref2 = reference_forward(x2, w1, b1, w2, b2)
    assert out2.shape == (batch2, 1)
    assert jnp.allclose(out2, ref2, atol=1e-5, rtol=1e-5)

    print("KERNEL_OK")
</pallas_src>

<mosaic_0001>
module attributes {stable_mosaic.version = 11 : i64} {
  func.func @_state_constraint_kernel(%arg0: i32, %arg1: memref<8x128xf32, #tpu.memory_space<vmem>>, %arg2: memref<128x64xf32, #tpu.memory_space<vmem>>, %arg3: memref<1x64xf32, #tpu.memory_space<vmem>>, %arg4: memref<64x4xf32, #tpu.memory_space<vmem>>, %arg5: memref<1x4xf32, #tpu.memory_space<vmem>>, %arg6: memref<1x4x8xf32, #tpu.memory_space<vmem>>) attributes {dimension_semantics = [#tpu.dimension_semantics<parallel>], iteration_bounds = array<i64: 1>, scalar_prefetch = 0 : i64, scratch_operands = 0 : i64, tpu.core_type = #tpu.core_type<tc>, window_params = [{transform_indices = @transform_0, window_bounds = array<i64: 8, 128>}, {pipeline_mode = #tpu.pipeline_mode<synchronous>, transform_indices = @transform_1, window_bounds = array<i64: 128, 64>}, {pipeline_mode = #tpu.pipeline_mode<synchronous>, transform_indices = @transform_2, window_bounds = array<i64: 1, 64>}, {pipeline_mode = #tpu.pipeline_mode<synchronous>, transform_indices = @transform_3, window_bounds = array<i64: 64, 4>}, {pipeline_mode = #tpu.pipeline_mode<synchronous>, transform_indices = @transform_4, window_bounds = array<i64: 1, 4>}, {transform_indices = @transform_5, window_bounds = array<i64: 1, 4, 8>}]} {
    %c0 = arith.constant 0 : index
    %c0_0 = arith.constant 0 : index
    %0 = vector.load %arg1[%c0, %c0_0] : memref<8x128xf32, #tpu.memory_space<vmem>>, vector<8x128xf32>
    %c0_1 = arith.constant 0 : index
    %c0_2 = arith.constant 0 : index
    %1 = vector.load %arg2[%c0_1, %c0_2] : memref<128x64xf32, #tpu.memory_space<vmem>>, vector<128x64xf32>
    %cst = arith.constant dense<0.000000e+00> : vector<8x64xf32>
    %2 = tpu.matmul %0, %1, %cst {dimension_numbers = #tpu.dot_dimension_numbers<[1], [0], [0], [1], [0, 0, 1, 1], [], []>} : vector<8x128xf32>, vector<128x64xf32>, vector<8x64xf32> -> vector<8x64xf32>
    %c0_3 = arith.constant 0 : index
    %c0_4 = arith.constant 0 : index
    %3 = vector.load %arg3[%c0_3, %c0_4] : memref<1x64xf32, #tpu.memory_space<vmem>>, vector<1x64xf32>
    %4 = vector.broadcast %3 : vector<1x64xf32> to vector<8x64xf32>
    %5 = arith.addf %2, %4 : vector<8x64xf32>
    %6 = math.tanh %5 : vector<8x64xf32>
    %c0_5 = arith.constant 0 : index
    %c0_6 = arith.constant 0 : index
    %7 = vector.load %arg4[%c0_5, %c0_6] : memref<64x4xf32, #tpu.memory_space<vmem>>, vector<64x4xf32>
    %cst_7 = arith.constant dense<0.000000e+00> : vector<8x4xf32>
    %8 = tpu.matmul %6, %7, %cst_7 {dimension_numbers = #tpu.dot_dimension_numbers<[1], [0], [0], [1], [0, 0, 1, 1], [], []>} : vector<8x64xf32>, vector<64x4xf32>, vector<8x4xf32> -> vector<8x4xf32>
    %c0_8 = arith.constant 0 : index
    %c0_9 = arith.constant 0 : index
    %9 = vector.load %arg5[%c0_8, %c0_9] : memref<1x4xf32, #tpu.memory_space<vmem>>, vector<1x4xf32>
    %10 = vector.broadcast %9 : vector<1x4xf32> to vector<8x4xf32>
    %11 = arith.addf %8, %10 : vector<8x4xf32>
    %12 = math.tanh %11 : vector<8x4xf32>
    %13 = tpu.transpose %12, [1, 0] : vector<8x4xf32> -> vector<4x8xf32>
    %14 = vector.shape_cast %13 : vector<4x8xf32> to vector<1x4x8xf32>
    %c0_10 = arith.constant 0 : index
    %c0_11 = arith.constant 0 : index
    %c0_12 = arith.constant 0 : index
    %15 = vector.load %arg6[%c0_10, %c0_11, %c0_12] : memref<1x4x8xf32, #tpu.memory_space<vmem>>, vector<1x4x8xf32>
    tpu.vector_store %arg6[%c0_10, %c0_11, %c0_12], %14 {strides = array<i32>} : memref<1x4x8xf32, #tpu.memory_space<vmem>>, vector<1x4x8xf32>,
    return
  }
  func.func @transform_0(%arg0: i32) -> (i32, i32) {
    %c0_i32 = arith.constant 0 : i32
    %c0_i32_0 = arith.constant 0 : i32
    return %arg0, %c0_i32 : i32, i32
  }
  func.func @transform_1(%arg0: i32) -> (i32, i32) {
    %c0_i32 = arith.constant 0 : i32
    %c0_i32_0 = arith.constant 0 : i32
    %c0_i32_1 = arith.constant 0 : i32
    return %c0_i32, %c0_i32_0 : i32, i32
  }
  func.func @transform_2(%arg0: i32) -> (i32, i32) {
    %c0_i32 = arith.constant 0 : i32
    %c0_i32_0 = arith.constant 0 : i32
    %c0_i32_1 = arith.constant 0 : i32
    return %c0_i32, %c0_i32_0 : i32, i32
  }
  func.func @transform_3(%arg0: i32) -> (i32, i32) {
    %c0_i32 = arith.constant 0 : i32
    %c0_i32_0 = arith.constant 0 : i32
    %c0_i32_1 = arith.constant 0 : i32
    return %c0_i32, %c0_i32_0 : i32, i32
  }
  func.func @transform_4(%arg0: i32) -> (i32, i32) {
    %c0_i32 = arith.constant 0 : i32
    %c0_i32_0 = arith.constant 0 : i32
    %c0_i32_1 = arith.constant 0 : i32
    return %c0_i32, %c0_i32_0 : i32, i32
  }
  func.func @transform_5(%arg0: i32) -> (i32, i32, i32) {
    %c0_i32 = arith.constant 0 : i32
    %c0_i32_0 = arith.constant 0 : i32
    %c0_i32_1 = arith.constant 0 : i32
    return %arg0, %c0_i32, %c0_i32_0 : i32, i32, i32
  }
}

</mosaic_0001>

<bundles_post_ra>
// kernel: tpu_custom_call.1
= control target key start
LH: loop header
LB: loop body
LE: loop exit
PB: predicated region body
PF: predicated region fallthrough
CT: control target
= control target key end

     0   :  { %v366_v1 = vmov 0.0   ;;  %vm367_vm0 = vmmov 0   ;;  %s509_s0 = inlined_call_operand.vmem [shape: f32[8,128], index: 0, kind: input, shape index: {}]   ;;  %s510_s1 = inlined_call_operand.vmem [shape: f32[128,64], index: 1, kind: input, shape index: {}]   ;;  %s511_s2 = inlined_call_operand.vmem [shape: f32[1,64], index: 2, kind: input, shape index: {}]   ;;  %s512_s3 = inlined_call_operand.vmem [shape: f32[64,4], index: 3, kind: input, shape index: {}]   ;;  %s513_s4 = inlined_call_operand.vmem [shape: f32[1,4], index: 4, kind: input, shape index: {}]   ;;  %s514_s5 = inlined_call_operand.hbm [shape: f32[1,4,8], index: 5, kind: output, shape index: {}]  }
   0x1   :  { %v37_v0 = vld [vmem:[%s510_s1 + $0x78] sm:$0xff]  ;;  %283 = vmatprep.subr.mxu0 %v366_v1  ;;  %v36_v2 = vld [vmem:[%s510_s1 + $0x70] sm:$0xff]  ;;  %315 = vmatprep.mubr.msk.f32.mxu0 %vm367_vm0, %v366_v1  ;;  %v35_v3 = vld [vmem:[%s510_s1 + $0x68] sm:$0xff] }
   0x2   :  { %284 = vmatpush3.msra.mxu0 %v37_v0  ;;  %318 = vmatprep.subr.mxu1 %v366_v1  ;;  %v34_v4 = vld [vmem:[%s510_s1 + $0x60] sm:$0xff] }
   0x3   :  { %285 = vmatprep.subr.mxu0 %v366_v1  ;;  %334 = vmatprep.mubr.msk.f32.mxu1 %vm367_vm0, %v366_v1 }
   0x4   :  { %286 = vmatpush3.msra.mxu0 %v36_v2 }
   0x5   :  { %287 = vmatprep.subr.mxu0 %v366_v1 }
   0x6   :  { %288 = vmatpush3.msra.mxu0 %v35_v3 }
   0x7   :  { %10 = vsyncpa [#allocation3], 0  ;;  %289 = vmatprep.subr.mxu0 %v366_v1  ;;  %v33_v5 = vld [vmem:[%s510_s1 + $0x58] sm:$0xff]  ;;  %v32_v6 = vld [vmem:[%s510_s1 + $0x50] sm:$0xff]  ;;  %vm131_vm1 = vcmask 523264   ;;  %vm238_vm2 = vcmask 60416  }
   0x8   :  { %290 = vmatpush3.msra.mxu0 %v34_v4  ;;  %v31_v7 = vld [vmem:[%s510_s1 + $0x48] sm:$0xff]  ;;  %v30_v8 = vld [vmem:[%s510_s1 + $0x40] sm:$0xff]  ;;  %v29_v9 = vld [vmem:[%s510_s1 + $0x38] sm:$0xff] }
   0x9   :  { %291 = vmatprep.subr.mxu0 %v366_v1  ;;  %v28_v10 = vld [vmem:[%s510_s1 + $0x30] sm:$0xff]  ;;  %v27_v11 = vld [vmem:[%s510_s1 + $0x28] sm:$0xff]  ;;  %v26_v12 = vld [vmem:[%s510_s1 + $0x20] sm:$0xff] }
   0xa   :  { %292 = vmatpush3.msra.mxu0 %v33_v5  ;;  %v25_v13 = vld [vmem:[%s510_s1 + $0x18] sm:$0xff]  ;;  %v24_v14 = vld [vmem:[%s510_s1 + $0x10] sm:$0xff]  ;;  %v23_v15 = vld [vmem:[%s510_s1 + $0x8] sm:$0xff] }
   0xb   :  { %293 = vmatprep.subr.mxu0 %v366_v1  ;;  %v22_v16 = vld [vmem:[%s510_s1] sm:$0xff]  ;;  %v123_v18 = vld [vmem:[%s512_s3 + $0x38] sm:$0xff]  ;;  %v122_v19 = vld [vmem:[%s512_s3 + $0x30] sm:$0xff] }
   0xc   :  { %294 = vmatpush3.msra.mxu0 %v32_v6  ;;  %v21_v17 = vld [vmem:[%s509_s0] sm:$0xff]  ;;  %319 = vmatpush3.msra.mxu1 %v123_v18  ;;  %v121_v20 = vld [vmem:[%s512_s3 + $0x28] sm:$0xff]  ;;  %v119_v22 = vld [vmem:[%s512_s3 + $0x18] sm:$0xff] }
   0xd   :  { %295 = vmatprep.subr.mxu0 %v366_v1  ;;  %320 = vmatprep.subr.mxu1 %v366_v1  ;;  %v120_v21 = vld [vmem:[%s512_s3 + $0x20] sm:$0xff]  ;;  %v118_v23 = vld [vmem:[%s512_s3 + $0x10] sm:$0xff]  ;;  %v117_v24 = vld [vmem:[%s512_s3 + $0x8] sm:$0xff] }
   0xe   :  { %296 = vmatpush3.msra.mxu0 %v31_v7  ;;  %321 = vmatpush3.msra.mxu1 %v122_v19  ;;  %v116_v25 = vld [vmem:[%s512_s3] sm:$0xff]  ;;  %s368_s3 = smov [#allocation2]  }
   0xf   :  { %297 = vmatprep.subr.mxu0 %v366_v1  ;;  %322 = vmatprep.subr.mxu1 %v366_v1  ;;  %v254_v26 = vld [vmem:[%s511_s2] ss:$0 sm:$0xff]  ;;  %s246_s20 = sshll.u32 %s368_s3, 4  ;;  %s247_s20 = int_to_ptr.vmem [resolvable:$true] %s246_s20 }
  0x10   :  { %298 = vmatpush3.msra.mxu0 %v30_v8  ;;  %323 = vmatpush3.msra.mxu1 %v121_v20  ;;  %v255_v31 = vld [vmem:[%s513_s4] ss:$0 sm:$0xff]  ;;  %s344_s2 = scalar_lea.vmem %s247_s20, 64  ;;  %p349_p1 = scmp.lt.s32.totalorder %s247_s20, %s247_s20 }
  0x11   :  { %299 = vmatprep.subr.mxu0 %v366_v1  ;;  %324 = vmatprep.subr.mxu1 %v366_v1  ;;  %p345_p0 = scmp.ne.s32.totalorder %s247_s20, %s344_s2  ;;  %p350_p2 = scmp.lt.s32.totalorder %s344_s2, %s344_s2 }
  0x12   :  { %300 = vmatpush3.msra.mxu0 %v29_v9  ;;  %325 = vmatpush3.msra.mxu1 %v120_v21 }
  0x13   :  { %301 = vmatprep.subr.mxu0 %v366_v1  ;;  %326 = vmatprep.subr.mxu1 %v366_v1  ;;  %p351_p3 = por %p350_p2, %p349_p1 }
  0x14   :  { %302 = vmatpush3.msra.mxu0 %v28_v10  ;;  %327 = vmatpush3.msra.mxu1 %v119_v22 }
  0x15   :  { %303 = vmatprep.subr.mxu0 %v366_v1  ;;  %328 = vmatprep.subr.mxu1 %v366_v1  ;;  %p352_p4 = pnand %p351_p3, %p345_p0 }
  0x16   :  { %304 = vmatpush3.msra.mxu0 %v27_v11  ;;  %329 = vmatpush3.msra.mxu1 %v118_v23 }
  0x17   :  { %305 = vmatprep.subr.mxu0 %v366_v1  ;;  %330 = vmatprep.subr.mxu1 %v366_v1 }
  0x18   :  { %306 = vmatpush3.msra.mxu0 %v26_v12  ;;  %331 = vmatpush3.msra.mxu1 %v117_v24 }
  0x19   :  { %307 = vmatprep.subr.mxu0 %v366_v1  ;;  %332 = vmatprep.subr.mxu1 %v366_v1 }
  0x1a   :  { %308 = vmatpush3.msra.mxu0 %v25_v13  ;;  %333 = vmatpush3.msra.mxu1 %v116_v25 }
  0x1b   :  { %309 = vmatprep.subr.mxu0 %v366_v1 }
  0x1c   :  { %310 = vmatpush3.msra.mxu0 %v24_v14 }
  0x1d   :  { %311 = vmatprep.subr.mxu0 %v366_v1 }
  0x1e   :  { %312 = vmatpush3.msra.mxu0 %v23_v15 }
  0x1f   :  { %313 = vmatprep.subr.mxu0 %v366_v1 }
  0x20   :  { %314 = vmatpush3.msra.mxu0 %v22_v16 }
  0x21   :  { %316 = vmatmul.mubr.f32.vlgmr.msra.gmra.mxu0 %v21_v17 }
  0xe1   :  { %v111_v27 = vpop.f32.mrf.mxu0 }
  0xe2   :  { %v112_v28 = vadd.f32 %v254_v26, %v111_v27 }
  0xe3   :  { %v317_v29 = vpop.f32.mrf.mxu0 }
  0xe4   :  { %340 = vtanh.f32 %v112_v28 }
  0xf1   :  { %v341_v30 = vpop.eup %340 }
  0xf2   :  { %335 = vmatmul.mubr.msk.f32.vlgmr.msra.gmra.mxu1 %vm131_vm1, %v341_v30 }
 0x1b2   :  { %v201_v32 = vpop.f32.mrf.mxu1 }
 0x1b3   :  { %v202_v33 = vadd.f32 %v255_v31, %v201_v32 }
 0x1b4   :  { %v336_v34 = vpop.f32.mrf.mxu1 }
 0x1b5   :  { %342 = vtanh.f32 %v202_v33 }
 0x1c2   :  { %v343_v35 = vpop.eup %342 }
 0x1c3   :  { %206 = vxpose.xlu0.b32.start.end [1/1] (short) (narrow) %v343_v35, 8 }
 0x23f   :  { %v222_v36 = vpop.trf.xlu0 }
 0x240   :  { %239 = vst.msk [vmem:[#allocation2] sm:$0xf] %vm238_vm2, %v222_v36 }
 0x241   :  { %355 = shalt.err (!%p352_p4)
}
 0x242   :  { %249 = dma.vmem_to_hbm [thread:$0]  %s247_s20, 64, %s514_s5, [#allocation3]  }
 0x243   :  { %364 = dma.done.wait [#allocation3], 64  }
 0x244   :  { %365 = vsyncadd [#allocation3], 4294967232 }
 0x245   :  { %253 = vsyncpa [#allocation3], 1 }

</bundles_post_ra>
